<compile_context>
chip_gen: v5e
topology: v5e:2x2
jax: 0.10.0
libtpu: 0.0.40
codegen_flags: <defaults>
</compile_context>

<pallas_src>
import functools
import math

import jax
import jax.numpy as jnp
from jax.experimental import pallas as pl
from jax.experimental.pallas import tpu as pltpu

_LANE = 128
_SUBLANE = 16  # bf16 sublane packing


def _round_up(n, m):
    return ((n + m - 1) // m) * m


def _vmem_budget():
    """Per-generation VMEM budget (bytes) for kernel buffers."""
    phys = 64 << 20  # conservative default (v7x per-core VMEM)
    try:
        phys = int(pltpu.get_tpu_info().vmem_capacity_bytes)
    except Exception:
        pass
    if phys >= (96 << 20):
        return phys - (24 << 20)            # v5e / v6e: ~104 MiB of 128 MiB
    return max(phys - (8 << 20), 24 << 20)  # v7x / fallback: ~56 MiB of 64 MiB


def _plan_tiles(m_rows, hidden, vocab, budget, *, tm_max, tv_max, in_bytes, out_bytes):
    """Pick (tm, tv, use_scratch) such that every VMEM buffer fits in `budget`.

    Budgeted terms: x double-buffer, W double-buffer, output double-buffer,
    (tm,1) m/l scratches and (optionally) the (nv, tm, tv) f32 logits scratch.
    """
    vocab_lane = _round_up(vocab, _LANE)
    margin = 2 << 20
    tm = max(_SUBLANE, min(tm_max, _round_up(max(m_rows, 1), _SUBLANE)))
    while True:
        x_dbuf = 2 * tm * hidden * in_bytes
        ml_bytes = 4 * tm * 4
        per_col = 2 * hidden * in_bytes + 2 * tm * out_bytes  # W dbuf + out dbuf per vocab col
        for use_scratch in (True, False):
            scratch = tm * (vocab_lane + tv_max) * 4 if use_scratch else 0
            avail = budget - margin - x_dbuf - ml_bytes - scratch
            if avail <= 0:
                continue
            tv = min((avail // per_col) // _LANE * _LANE, tv_max, vocab_lane)
            if tv >= _LANE:
                return tm, int(tv), use_scratch
        if tm <= _SUBLANE:
            # TODO(synk): Option B for huge-vocab/huge-hidden configs -- stream
            # unnormalized logits through the output and re-read them via
            # input_output_aliases instead of recomputing the matmul.
            return _SUBLANE, _LANE, False
        tm = max(_SUBLANE, _round_up(tm // 2, _SUBLANE))


def _generator_kernel(x_ref, w_ref, o_ref, m_ref, l_ref, logits_ref=None, *,
                      nv, tv, vocab, vocab_pad):
    """Streaming log-softmax over vocab tiles.

    Grid = (row_tiles, 2 * nv); inner axis k is "arbitrary":
      k in [0, nv) : pass 1 -- matmul tile, stash logits, online max/sum-exp
      k == nv      : fold   -- m <- m + log(l)
      k in [nv,2nv): pass 2 -- emit (stored or recomputed) logits - lse
    """
    k = pl.program_id(1)
    use_scratch = logits_ref is not None

    @pl.when(k == 0)
    def _init():
        m_ref[...] = jnp.full(m_ref.shape, -jnp.inf, dtype=m_ref.dtype)
        l_ref[...] = jnp.zeros(l_ref.shape, dtype=l_ref.dtype)

    def _logits(vt):
        # bf16 x bf16 -> f32 on the MXU; softmax math stays in f32.
        out = jnp.dot(x_ref[...], w_ref[...], preferred_element_type=jnp.float32)
        if vocab_pad != vocab:
            # Mask padded vocab columns (only present in the last vocab tile).
            col = vt * tv + jax.lax.broadcasted_iota(jnp.int32, out.shape, 1)
            out = jnp.where(col < vocab, out, -jnp.inf)
        return out

    @pl.when(k < nv)
    def _pass1():
        logits = _logits(k)
        if use_scratch:
            logits_ref[k] = logits
        m_prev = m_ref[...]
        m_new = jnp.maximum(m_prev, jnp.max(logits, axis=-1, keepdims=True))
        l_ref[...] = (l_ref[...] * jnp.exp(m_prev - m_new)
                      + jnp.sum(jnp.exp(logits - m_new), axis=-1, keepdims=True))
        m_ref[...] = m_new

    @pl.when(k == nv)
    def _fold():
        # Fold max and log-sum into one per-row scalar (the log-sum-exp) so
        # pass 2 does a single wide subtraction.
        m_ref[...] = m_ref[...] + jnp.log(l_ref[...])

    @pl.when(k >= nv)
    def _pass2():
        j = k - nv
        tile = logits_ref[j] if use_scratch else _logits(j)
        o_ref[...] = (tile - m_ref[...]).astype(o_ref.dtype)


def generator_forward(x, w_t, *, out_dtype=jnp.float32, matmul_dtype=jnp.bfloat16,
                      tm_max=None, tv_max=2048):
    """log_softmax(x @ w_t, axis=-1).

    x   : [..., hidden] activations (any float dtype).
    w_t : [hidden, vocab] -- the transposed nn.Linear weight.  Carry it in
          `matmul_dtype` (bf16) persistently to avoid a per-call cast/copy.
    out_dtype: f32 matches PyTorch; bf16 is the fast path (halves the output
          HBM writeback, which dominates once W is only streamed once).
    """
    orig_shape = x.shape
    hidden = orig_shape[-1]
    assert w_t.shape[0] == hidden, "w_t must be [hidden, vocab]"
    vocab = w_t.shape[1]

    x2d = x.reshape(-1, hidden)
    m_rows = x2d.shape[0]

    in_bytes = jnp.dtype(matmul_dtype).itemsize
    out_bytes = jnp.dtype(out_dtype).itemsize

    budget = _vmem_budget()
    if tm_max is None:
        tm_max = 512 if budget >= (96 << 20) else 256
    # TODO(synk): on v7x, when the row grid collapses to a single tile (decode),
    # split the vocab sweep across the two TensorCores instead.

    tm, tv, use_scratch = _plan_tiles(m_rows, hidden, vocab, budget,
                                      tm_max=tm_max, tv_max=tv_max,
                                      in_bytes=in_bytes, out_bytes=out_bytes)

    m_pad = _round_up(max(m_rows, 1), tm)
    vocab_pad = _round_up(vocab, tv)
    nv = vocab_pad // tv

    # Cast activations before padding (avoids an extra f32 HBM copy of x).
    xk = x2d.astype(matmul_dtype)
    if m_pad != m_rows:
        xk = jnp.pad(xk, ((0, m_pad - m_rows), (0, 0)))

    # Weight: no cast if the caller already stores it in matmul_dtype.
    wk = w_t if w_t.dtype == matmul_dtype else w_t.astype(matmul_dtype)
    if vocab_pad != vocab:
        # TODO(synk): pre-pad the weight once at init for vocab sizes that are
        # not a multiple of the vocab tile (avoids a per-call HBM copy of W).
        wk = jnp.pad(wk, ((0, 0), (0, vocab_pad - vocab)))

    kernel = functools.partial(_generator_kernel, nv=nv, tv=tv,
                               vocab=vocab, vocab_pad=vocab_pad)

    scratch_shapes = [pltpu.VMEM((tm, 1), jnp.float32),   # running max / lse
                      pltpu.VMEM((tm, 1), jnp.float32)]   # running sum-exp
    if use_scratch:
        # Logits stash: W is streamed once, matmul done once per row tile.
        # W block index is pinned during pass 2 so no W DMA is issued there.
        w_index = lambda i, k: (0, jnp.minimum(k, nv - 1))
        scratch_shapes.append(pltpu.VMEM((nv, tm, tv), jnp.float32))
    else:
        # Fallback (scratch does not fit VMEM): recompute logits in pass 2.
        w_index = lambda i, k: (0, k % nv)
    # TODO(synk): consider pipeline_mode=pl.Buffered(3) on the W spec for
    # latency-exposed (small-tm) calls, VMEM permitting.

    out = pl.pallas_call(
        kernel,
        out_shape=jax.ShapeDtypeStruct((m_pad, vocab_pad), out_dtype),
        grid_spec=pltpu.PrefetchScalarGridSpec(
            num_scalar_prefetch=0,
            grid=(m_pad // tm, 2 * nv),
            in_specs=[
                # x tile stays VMEM-resident across the whole vocab sweep.
                pl.BlockSpec((tm, hidden), lambda i, k: (i, 0)),
                pl.BlockSpec((hidden, tv), w_index),
            ],
            # NOTE: during pass 1 the output block index is pinned at (i, 0);
            # the block is first written at k == nv (before the index ever
            # advances), which relies on standard output-revisit semantics with
            # the inner axis marked "arbitrary".  Keep it that way.
            out_specs=pl.BlockSpec((tm, tv),
                                   lambda i, k: (i, jnp.maximum(k - nv, 0))),
            scratch_shapes=scratch_shapes,
        ),
        compiler_params=pltpu.CompilerParams(
            dimension_semantics=("parallel", "arbitrary"),
            vmem_limit_bytes=int(budget),
        ),
    )(xk, wk)

    out = out[:m_rows, :vocab]
    return out.reshape(*orig_shape[:-1], vocab)


if __name__ == "__main__":
    # Small shapes consistent with the module: batch=2, seq=8, hidden=32, vocab=128
    batch, seq, hidden, vocab = 2, 8, 32, 128

    key = jax.random.PRNGKey(0)
    kx, kw = jax.random.split(key)
    x = jax.random.normal(kx, (batch, seq, hidden), dtype=jnp.float32)
    bound = 1.0 / math.sqrt(hidden)
    # nn.Linear(hidden, vocab, bias=False) weight layout: [vocab, hidden]
    w = jax.random.uniform(kw, (vocab, hidden), dtype=jnp.float32,
                           minval=-bound, maxval=bound)

    # One-time (init-style) transpose + bf16 cast of the weight -- no per-call cast.
    w_t = jnp.asarray(w.T, dtype=jnp.bfloat16)

    def _ref(xi, wt):
        # Reference matching the kernel's bf16-input / f32-accumulate matmul.
        xb = xi.astype(jnp.bfloat16).astype(jnp.float32)
        wb = wt.astype(jnp.float32)
        logits = jnp.einsum("...h,hv->...v", xb, wb,
                            precision=jax.lax.Precision.HIGHEST)
        return jax.nn.log_softmax(logits, axis=-1)

    out = jax.block_until_ready(generator_forward(x, w_t))
    ref = _ref(x, w_t)
    assert out.shape == (batch, seq, vocab)
    assert out.dtype == jnp.float32
    assert jnp.allclose(out, ref, atol=2e-4, rtol=2e-4), \
        float(jnp.max(jnp.abs(out - ref)))

    # Ragged row count: exercises the row-padding path (batch*seq % tile != 0).
    x2 = jax.random.normal(jax.random.PRNGKey(1), (3, 5, hidden), dtype=jnp.float32)
    out2 = jax.block_until_ready(generator_forward(x2, w_t))
    ref2 = _ref(x2, w_t)
    assert out2.shape == (3, 5, vocab)
    assert jnp.allclose(out2, ref2, atol=2e-4, rtol=2e-4)

    # Vocab not a multiple of 128: exercises the vocab pad + mask path.
    vocab3 = 200
    w3_t = jax.random.uniform(jax.random.PRNGKey(2), (hidden, vocab3),
                              dtype=jnp.float32, minval=-bound,
                              maxval=bound).astype(jnp.bfloat16)
    out3 = jax.block_until_ready(generator_forward(x, w3_t))
    ref3 = _ref(x, w3_t)
    assert out3.shape == (batch, seq, vocab3)
    assert jnp.allclose(out3, ref3, atol=2e-4, rtol=2e-4)

    print("KERNEL_OK")
</pallas_src>

<mosaic_0001>
module attributes {stable_mosaic.version = 11 : i64} {
  func.func @_generator_kernel(%arg0: i32, %arg1: i32, %arg2: memref<16x32xbf16, #tpu.memory_space<vmem>>, %arg3: memref<32x128xbf16, #tpu.memory_space<vmem>>, %arg4: memref<16x128xf32, #tpu.memory_space<vmem>>, %arg5: memref<16x1xf32, #tpu.memory_space<vmem>>, %arg6: memref<16x1xf32, #tpu.memory_space<vmem>>, %arg7: memref<1x16x128xf32, #tpu.memory_space<vmem>>) attributes {dimension_semantics = [#tpu.dimension_semantics<parallel>, #tpu.dimension_semantics<arbitrary>], iteration_bounds = array<i64: 1, 2>, scalar_prefetch = 0 : i64, scratch_operands = 3 : i64, tpu.core_type = #tpu.core_type<tc>, window_params = [{transform_indices = @transform_0, window_bounds = array<i64: 16, 32>}, {transform_indices = @transform_1, window_bounds = array<i64: 32, 128>}, {transform_indices = @transform_2, window_bounds = array<i64: 16, 128>}]} {
    %c0_i32 = arith.constant 0 : i32
    %0 = arith.cmpi eq, %arg1, %c0_i32 : i32
    %1 = arith.extui %0 : i1 to i32
    %c0_i32_0 = arith.constant 0 : i32
    %2 = arith.cmpi ne, %1, %c0_i32_0 : i32
    scf.if %2 {
      %cst = arith.constant 0xFF800000 : f32
      %12 = vector.broadcast %cst : f32 to vector<16x1xf32>
      %c0 = arith.constant 0 : index
      %c0_6 = arith.constant 0 : index
      %13 = vector.load %arg5[%c0, %c0_6] : memref<16x1xf32, #tpu.memory_space<vmem>>, vector<16x1xf32>
      tpu.vector_store %arg5[%c0, %c0_6], %12 {strides = array<i32>} : memref<16x1xf32, #tpu.memory_space<vmem>>, vector<16x1xf32>,
      %cst_7 = arith.constant 0.000000e+00 : f32
      %14 = vector.broadcast %cst_7 : f32 to vector<16x1xf32>
      %c0_8 = arith.constant 0 : index
      %c0_9 = arith.constant 0 : index
      %15 = vector.load %arg6[%c0_8, %c0_9] : memref<16x1xf32, #tpu.memory_space<vmem>>, vector<16x1xf32>
      tpu.vector_store %arg6[%c0_8, %c0_9], %14 {strides = array<i32>} : memref<16x1xf32, #tpu.memory_space<vmem>>, vector<16x1xf32>,
    } else {
    }
    %c1_i32 = arith.constant 1 : i32
    %3 = arith.cmpi slt, %arg1, %c1_i32 : i32
    %4 = arith.extui %3 : i1 to i32
    %c0_i32_1 = arith.constant 0 : i32
    %5 = arith.cmpi ne, %4, %c0_i32_1 : i32
    scf.if %5 {
      %c0 = arith.constant 0 : index
      %c0_6 = arith.constant 0 : index
      %12 = vector.load %arg2[%c0, %c0_6] : memref<16x32xbf16, #tpu.memory_space<vmem>>, vector<16x32xbf16>
      %c0_7 = arith.constant 0 : index
      %c0_8 = arith.constant 0 : index
      %13 = vector.load %arg3[%c0_7, %c0_8] : memref<32x128xbf16, #tpu.memory_space<vmem>>, vector<32x128xbf16>
      %cst = arith.constant dense<0.000000e+00> : vector<16x128xf32>
      %14 = tpu.matmul %12, %13, %cst {dimension_numbers = #tpu.dot_dimension_numbers<[1], [0], [0], [1], [0, 0, 1, 1], [], []>} : vector<16x32xbf16>, vector<32x128xbf16>, vector<16x128xf32> -> vector<16x128xf32>
      %15 = arith.index_cast %arg1 : i32 to index
      %c0_9 = arith.constant 0 : index
      %c0_10 = arith.constant 0 : index
      %16 = vector.load %arg7[%15, %c0_9, %c0_10] : memref<1x16x128xf32, #tpu.memory_space<vmem>>, vector<1x16x128xf32>
      %17 = vector.shape_cast %16 : vector<1x16x128xf32> to vector<16x128xf32>
      %18 = vector.shape_cast %14 : vector<16x128xf32> to vector<1x16x128xf32>
      tpu.vector_store %arg7[%15, %c0_9, %c0_10], %18 {strides = array<i32>} : memref<1x16x128xf32, #tpu.memory_space<vmem>>, vector<1x16x128xf32>,
      %c0_11 = arith.constant 0 : index
      %c0_12 = arith.constant 0 : index
      %19 = vector.load %arg5[%c0_11, %c0_12] : memref<16x1xf32, #tpu.memory_space<vmem>>, vector<16x1xf32>
      %cst_13 = arith.constant dense<0xFF800000> : vector<16xf32>
      %20 = vector.multi_reduction <maximumf>, %14, %cst_13 [1] : vector<16x128xf32> to vector<16xf32>
      %21 = vector.shape_cast %20 : vector<16xf32> to vector<16x1xf32>
      %22 = arith.maximumf %19, %21 : vector<16x1xf32>
      %c0_14 = arith.constant 0 : index
      %c0_15 = arith.constant 0 : index
      %23 = vector.load %arg6[%c0_14, %c0_15] : memref<16x1xf32, #tpu.memory_space<vmem>>, vector<16x1xf32>
      %24 = arith.subf %19, %22 : vector<16x1xf32>
      %25 = math.exp %24 : vector<16x1xf32>
      %26 = arith.mulf %23, %25 : vector<16x1xf32>
      %27 = vector.broadcast %22 : vector<16x1xf32> to vector<16x128xf32>
      %28 = arith.subf %14, %27 : vector<16x128xf32>
      %29 = math.exp %28 : vector<16x128xf32>
      %cst_16 = arith.constant dense<0.000000e+00> : vector<16xf32>
      %30 = vector.multi_reduction <add>, %29, %cst_16 [1] : vector<16x128xf32> to vector<16xf32>
      %31 = vector.shape_cast %30 : vector<16xf32> to vector<16x1xf32>
      %32 = arith.addf %26, %31 : vector<16x1xf32>
      %c0_17 = arith.constant 0 : index
      %c0_18 = arith.constant 0 : index
      %33 = vector.load %arg6[%c0_17, %c0_18] : memref<16x1xf32, #tpu.memory_space<vmem>>, vector<16x1xf32>
      tpu.vector_store %arg6[%c0_17, %c0_18], %32 {strides = array<i32>} : memref<16x1xf32, #tpu.memory_space<vmem>>, vector<16x1xf32>,
      %c0_19 = arith.constant 0 : index
      %c0_20 = arith.constant 0 : index
      %34 = vector.load %arg5[%c0_19, %c0_20] : memref<16x1xf32, #tpu.memory_space<vmem>>, vector<16x1xf32>
      tpu.vector_store %arg5[%c0_19, %c0_20], %22 {strides = array<i32>} : memref<16x1xf32, #tpu.memory_space<vmem>>, vector<16x1xf32>,
    } else {
    }
    %c1_i32_2 = arith.constant 1 : i32
    %6 = arith.cmpi eq, %arg1, %c1_i32_2 : i32
    %7 = arith.extui %6 : i1 to i32
    %c0_i32_3 = arith.constant 0 : i32
    %8 = arith.cmpi ne, %7, %c0_i32_3 : i32
    scf.if %8 {
      %c0 = arith.constant 0 : index
      %c0_6 = arith.constant 0 : index
      %12 = vector.load %arg5[%c0, %c0_6] : memref<16x1xf32, #tpu.memory_space<vmem>>, vector<16x1xf32>
      %c0_7 = arith.constant 0 : index
      %c0_8 = arith.constant 0 : index
      %13 = vector.load %arg6[%c0_7, %c0_8] : memref<16x1xf32, #tpu.memory_space<vmem>>, vector<16x1xf32>
      %14 = math.log %13 : vector<16x1xf32>
      %15 = arith.addf %12, %14 : vector<16x1xf32>
      %c0_9 = arith.constant 0 : index
      %c0_10 = arith.constant 0 : index
      %16 = vector.load %arg5[%c0_9, %c0_10] : memref<16x1xf32, #tpu.memory_space<vmem>>, vector<16x1xf32>
      tpu.vector_store %arg5[%c0_9, %c0_10], %15 {strides = array<i32>} : memref<16x1xf32, #tpu.memory_space<vmem>>, vector<16x1xf32>,
    } else {
    }
    %c1_i32_4 = arith.constant 1 : i32
    %9 = arith.cmpi sge, %arg1, %c1_i32_4 : i32
    %10 = arith.extui %9 : i1 to i32
    %c0_i32_5 = arith.constant 0 : i32
    %11 = arith.cmpi ne, %10, %c0_i32_5 : i32
    scf.if %11 {
      %c1_i32_6 = arith.constant 1 : i32
      %12 = arith.subi %arg1, %c1_i32_6 : i32
      %13 = arith.index_cast %12 : i32 to index
      %c0 = arith.constant 0 : index
      %c0_7 = arith.constant 0 : index
      %14 = vector.load %arg7[%13, %c0, %c0_7] : memref<1x16x128xf32, #tpu.memory_space<vmem>>, vector<1x16x128xf32>
      %15 = vector.shape_cast %14 : vector<1x16x128xf32> to vector<16x128xf32>
      %c0_8 = arith.constant 0 : index
      %c0_9 = arith.constant 0 : index
      %16 = vector.load %arg5[%c0_8, %c0_9] : memref<16x1xf32, #tpu.memory_space<vmem>>, vector<16x1xf32>
      %17 = vector.broadcast %16 : vector<16x1xf32> to vector<16x128xf32>
      %18 = arith.subf %15, %17 : vector<16x128xf32>
      %c0_10 = arith.constant 0 : index
      %c0_11 = arith.constant 0 : index
      %19 = vector.load %arg4[%c0_10, %c0_11] : memref<16x128xf32, #tpu.memory_space<vmem>>, vector<16x128xf32>
      tpu.vector_store %arg4[%c0_10, %c0_11], %18 {strides = array<i32>} : memref<16x128xf32, #tpu.memory_space<vmem>>, vector<16x128xf32>,
    } else {
    }
    return
  }
  func.func @transform_0(%arg0: i32, %arg1: i32) -> (i32, i32) {
    %c0_i32 = arith.constant 0 : i32
    %c0_i32_0 = arith.constant 0 : i32
    return %arg0, %c0_i32 : i32, i32
  }
  func.func @transform_1(%arg0: i32, %arg1: i32) -> (i32, i32) {
    %c0_i32 = arith.constant 0 : i32
    %0 = arith.minsi %arg1, %c0_i32 : i32
    %c0_i32_0 = arith.constant 0 : i32
    %c0_i32_1 = arith.constant 0 : i32
    return %c0_i32_0, %0 : i32, i32
  }
  func.func @transform_2(%arg0: i32, %arg1: i32) -> (i32, i32) {
    %c1_i32 = arith.constant 1 : i32
    %0 = arith.subi %arg1, %c1_i32 : i32
    %c0_i32 = arith.constant 0 : i32
    %1 = arith.maxsi %0, %c0_i32 : i32
    %c0_i32_0 = arith.constant 0 : i32
    return %arg0, %1 : i32, i32
  }
}

</mosaic_0001>

<bundles_post_ra>
// kernel: tpu_custom_call.1
= control target key start
LH: loop header
LB: loop body
LE: loop exit
PB: predicated region body
PF: predicated region fallthrough
CT: control target
= control target key end

     0   :  { %7 = vsyncpa [#allocation6], 0  ;;  %s998_s0 = inlined_call_operand.hbm [shape: bf16[16,32], index: 0, kind: input, shape index: {}]   ;;  %s999_s1 = inlined_call_operand.hbm [shape: bf16[32,128], index: 1, kind: input, shape index: {}]   ;;  %s1000_s2 = inlined_call_operand.hbm [shape: f32[16,128], index: 2, kind: output, shape index: {}]  }
   0x1   :  { %8 = vsyncpa [#allocation9], 0 }
   0x2   :  { %10 = vsyncpa [#allocation9 + $0x1], 0 }
   0x3   :  { %11 = vsyncpa [#allocation7], 0 }
   0x4   :  { %13 = vsyncpa [#allocation7 + $0x1], 0  ;;  %s840_s9 = smov 0   ;;  %s842_s10 = smov 0  }
   0x5   :  { %s844_s11 = smov 0   ;;  %s846_s12 = smov 0  }
   0x6   :  { %s848_s13 = smov 0   ;;  %s850_s14 = smov 0  }
   0x7   :  { %s852_s15 = smov 0  }
   0x8 LB: > { %s488_s16 = sadd.s32 4294967295, %s813_s15   ;;  %s489_s17 = sadd.s32 4294967294, %s813_s15   ;;  %s813_s15 = sphi %s852_s15, %s19_s15   ;;  %s809_s14 = sphi %s850_s14, %s1010_s14   ;;  %s805_s13 = sphi %s848_s13, %s1009_s13   ;;  %s801_s12 = sphi %s846_s12, %s988_s12   ;;  %s797_s11 = sphi %s844_s11, %s1008_s11   ;;  %s793_s10 = sphi %s842_s10, %s983_s10   ;;  %s789_s9 = sphi %s840_s9, %s1007_s9  }
   0x9   : > { %p81_p0 = scmp.ne.s32.totalorder %s801_s12, %s797_s11  ;;  %p876_p1 = scmp.eq.s32.totalorder %s488_s16, 0 }
   0xa   : > { %p785_p2 = scmp.ne.s32.totalorder %s793_s10, 0  ;;  %p113_p4 = scmp.eq.s32.totalorder %s488_s16, 1 }
   0xb   : > { %p883_p3 = por %p876_p1, %p81_p0  ;;  %p118_p5 = scmp.ne.s32.totalorder %s793_s10, %s789_s9 }
   0xc   : > { %p119_p6 = scmp.eq.s32.totalorder %s489_s17, 1  ;;  %p889_p7 = por %p785_p2, %p113_p4 }
   0xd   : > { %p492_p8 = scmp.ge.s32.totalorder %s813_s15, 1  ;;  %p126_p10 = scmp.lt.s32.totalorder %s813_s15, 3 }
   0xe   : > { %p894_p9 = por %p119_p6, %p118_p5  ;;  %s140_s24 = sshll.u32 %s998_s0, 4  ;;  %s141_s24 = int_to_ptr.hbm [resolvable:$true] %s140_s24 }
   0xf   : > { %p902_p11 = pnand %p492_p8, %p126_p10  ;;  %s815_s26 = smov [#allocation5]  }
  0x10   : > { %s142_s27 = sshll.u32 %s815_s26, 4  ;;  %s816_s28 = smov 64   ;;  %s143_s27 = int_to_ptr.vmem [resolvable:$true] %s142_s27 }
  0x11   : > { %p537_p12 = pneg %p902_p11  ;;  %s817_s29 = smov 4  }
  0x12   : > { %s28_s30 = sadd.s32 1, %s809_s14  ;;  %p786_p4 = scmp.ne.s32.totalorder %s801_s12, 0 }
  0x13   : > { %p538_p13 = pnand %p537_p12, %p876_p1  ;;  %p29_p2 = scmp.ge.s32.totalorder %s28_s30, 2 }
  0x14   : > { %p76_p5 = scmp.eq.s32.totalorder %s813_s15, 0  ;;  %p550_p8 = scmp.lt.s32.totalorder %s813_s15, 2 }
  0x15   : > { %540 = dma.hbm_to_vmem [thread:$0]  (!%p538_p13), %s141_s24, 128, %s143_s27, [#allocation6], %s816_s28, %s816_s28, %s817_s29  }
  0x16   : > { %s1012_s30 = smov (%p29_p2, %s28_s30), 0  ;;  %p77_p6 = por %p786_p4, %p76_p5 }
  0x17   : > { %s167_s5 = sshll.u32 %s999_s1, 4  ;;  %s818_s6 = smov [#allocation8]   ;;  %s168_s5 = int_to_ptr.hbm [resolvable:$true] %s167_s5 }
  0x18   : > { %s169_s7 = sshll.u32 %s818_s6, 4  ;;  %p542_p10 = pnand %p550_p8, %p77_p6  ;;  %s170_s7 = int_to_ptr.vmem [resolvable:$true] %s169_s7 }
  0x19   : > { %s679_s8 = sshra.s32 %s168_s5, 4  ;;  %s686_s22 = scalar_lea.hbm %s999_s1, 16  ;;  %s680_s8 = int_to_ptr.hbm [resolvable:$true] %s679_s8 }
  0x1a   : > { %s681_s11 = scalar_lea.hbm %s680_s8, 16  ;;  %p683_p13 = pneg %p542_p10 }
  0x1b   : > { %p682_p12 = scmp.ne.s32.totalorder %s680_s8, %s681_s11  ;;  %p688_p4 = scmp.lt.s32.totalorder %s686_s22, %s681_s11 }
  0x1d   : > { %p684_p0 = pnand %p683_p13, %p682_p12 }
  0x1f   : > { %p685_p2 = pneg %p684_p0 }
  0x21   : > { %p690_p5 = pnand %p688_p4, %p685_p2 }
  0x23   : > { %693 = shalt.err (!%p690_p5)
}
  0x24   : > { %544 = dma.hbm_to_vmem [thread:$0]  (!%p542_p10), %s168_s5, 256, %s170_s7, [#allocation9], %s816_s28, %s816_s28, %s817_s29  }
  0x25   : > { %181 = sbr.rel (%p902_p11) target bundleno = 747 (0x2eb), region = 28 }
  0x2a   : > { %774 = dma.done.wait (%p876_p1), [#allocation6], 128  }
  0x2b   : > { %776 = vsyncadd (%p876_p1), [#allocation6], 4294967168  ;;  %s188_s23 = sand.u32 1, %s801_s12  }
  0x2c   : > { %s499_s24 = sshll.u32 %s188_s23, 4  ;;  %s189_s26 = scalar_lea.sflag [#allocation9], %s188_s23 }
  0x2d   : > { %s192_s27 = scalar_lea.vmem [#allocation8], %s499_s24 }
  0x2e   : > { %778 = dma.done.wait (%p883_p3), %s189_s26, 256  }
  0x2f   : > { %780 = vsyncadd (%p883_p3), %s189_s26, 4294967040  ;;  %s211_s25 = sand.u32 1, %s793_s10   ;;  %p501_p1 = scmp.ne.s32.totalorder %s805_s13, 0 }
  0x30   : > { %s500_s28 = sshll.u32 %s211_s25, 4 }
  0x31   : > { %s943_s29 = scalar_lea.vmem [#allocation10], %s500_s28  ;;  %225 = sbr.rel (%p501_p1) target bundleno = 59 (0x3b), region = 40 }
  0x36   : > { %vm226_vm0 = vcmask 7168   ;;  %v819_v0 = vmov -inf   ;;  %v820_v1 = vmov 0.0  }
  0x37   : > { %227 = vst.msk [vmem:[#allocation2] sm:$0xff] %vm226_vm0, %v819_v0 }
  0x38   : > { %228 = vst.msk [vmem:[#allocation2 + $0x8] sm:$0xff] %vm226_vm0, %v819_v0 }
  0x39   : > { %229 = vst.msk [vmem:[#allocation3] sm:$0xff] %vm226_vm0, %v820_v1 }
  0x3a   : > { %230 = vst.msk [vmem:[#allocation3 + $0x8] sm:$0xff] %vm226_vm0, %v820_v1 }
  0x3b PF: > { %p502_p3 = scmp.ge.s32.totalorder %s805_s13, 1 }
  0x3c   : > { %s516_s18 = sshll.u32 (!%p502_p3), %s805_s13, 4 }
  0x3d   : > { %234 = sbr.rel (%p502_p3) target bundleno = 571 (0x23b), region = 44  ;;  %s277_s19 = scalar_lea.vmem (!%p502_p3), [#allocation4], %s516_s18 }
  0x42   : > { %v528_v2 = vld [vmem:[%s192_s27 + $0x8] sm:$0xff]  ;;  %v527_v3 = vld [vmem:[%s192_s27] sm:$0xff]  ;;  %vm258_vm1 = vcmask 261120   ;;  %v821_v7 = vmov 0   ;;  %vm320_vm2 = vcmask 7168  }
  0x43   : > { %268 = vmatpush.bf16.msra.mxu0 %v528_v2  ;;  %v526_v4 = vld [vmem:[#allocation5] sm:$0xff]  ;;  %634 = vset.pattern.permute.xlu1 %v821_v7  ;;  %v280_v8 = vld [vmem:[#allocation2] sm:$0xff]  ;;  %v281_v12 = vld [vmem:[#allocation2 + $0x8] sm:$0xff] }
  0x44   : > { %635 = vset.pattern.permute.xlu0 %v821_v7  ;;  %v288_v27 = vld [vmem:[#allocation3] sm:$0xff]  ;;  %v289_v32 = vld [vmem:[#allocation3 + $0x8] sm:$0xff] }
  0x47   : > { %269 = vmatpush.bf16.msra.mxu0 %v527_v3 }
  0x4a   : > { %515 = vmatmul.msk.bf16.vlgmr.msra.gmra.mxu0 %vm258_vm1, %v526_v4 }
  0xc7   : > { %v271_v5 = vpop.f32.mrf.mxu0 }
  0xc8   : > { %282 = vmax.xlane.f32.xlu0 %v271_v5  ;;  %278 = vst [vmem:[%s277_s19] sm:$0xff] %v271_v5 }
  0xcf   : > { %v273_v6 = vpop.f32.mrf.mxu0 }
  0xd0   : > { %279 = vst [vmem:[%s277_s19 + $0x8] sm:$0xff] %v273_v6  ;;  %284 = vmax.xlane.f32.xlu0 %v273_v6 }
 0x13b   : > { %v283_v9 = vpop.xlane.xlu0 %282 }
 0x13c   : > { %v286_v10 = vmax.f32 %v280_v8, %v283_v9 }
 0x13e   : > { %v290_v11 = vsub.f32 %v280_v8, %v286_v10  ;;  %323 = vst.msk [vmem:[#allocation2] sm:$0xff] %vm320_vm2, %v286_v10  ;;  %300 = vperm.xlu1 %634, %v286_v10  }
 0x140   : > { %v292_v24 = vmul.f32 1.442695, %v290_v11 }
 0x143   : > { %v285_v13 = vpop.xlane.xlu0 %284 }
 0x144   : > { %v287_v14 = vmax.f32 %v281_v12, %v285_v13 }
 0x146   : > { %v291_v15 = vsub.f32 %v281_v12, %v287_v14  ;;  %324 = vst.msk [vmem:[#allocation2 + $0x8] sm:$0xff] %vm320_vm2, %v287_v14  ;;  %305 = vperm.xlu1 %634, %v287_v14  }
 0x148   : > { %v294_v25 = vmul.f32 1.442695, %v291_v15 }
 0x1b0   : > { %v301_v16 = vpop.permute.xlu1 %300 }
 0x1b1   : > { %v308_v17 = vsub.f32 %v271_v5, %v301_v16 }
 0x1b3   : > { %v310_v18 = vmul.f32 1.442695, %v308_v17 }
 0x1b5   : > { %636 = vpow2.f32 %v310_v18 }
 0x1b8   : > { %v306_v19 = vpop.permute.xlu1 %305 }
 0x1b9   : > { %v309_v20 = vsub.f32 %v273_v6, %v306_v19 }
 0x1bb   : > { %v637_v21 = vpop.eup %636  ;;  %v312_v22 = vmul.f32 1.442695, %v309_v20 }
 0x1bc   : > { %314 = vadd.xlane.f32.xlu2 %v637_v21 }
 0x1bd   : > { %638 = vpow2.f32 %v312_v22 }
 0x1be   : > { %640 = vpow2.f32 %v292_v24 }
 0x1bf   : > { %642 = vpow2.f32 %v294_v25 }
 0x1c3   : > { %v639_v23 = vpop.eup %638 }
 0x1c4   : > { %316 = vadd.xlane.f32.xlu2 %v639_v23  ;;  %v641_v26 = vpop.eup %640 }
 0x1c5   : > { %v296_v28 = vmul.f32 %v641_v26, %v288_v27  ;;  %v643_v31 = vpop.eup %642 }
 0x1c6   : > { %v297_v33 = vmul.f32 %v643_v31, %v289_v32 }
 0x22f   : > { %v315_v29 = vpop.xlane.xlu2 %314 }
 0x230   : > { %v318_v30 = vadd.f32 %v315_v29, %v296_v28 }
 0x232   : > { %321 = vst.msk [vmem:[#allocation3] sm:$0xff] %vm320_vm2, %v318_v30 }
 0x237   : > { %v317_v34 = vpop.xlane.xlu2 %316 }
 0x238   : > { %v319_v35 = vadd.f32 %v317_v34, %v297_v33 }
 0x23a   : > { %322 = vst.msk [vmem:[#allocation3 + $0x8] sm:$0xff] %vm320_vm2, %v319_v35 }
 0x23b PF: > { %p517_p11 = scmp.ne.s32.totalorder %s805_s13, 1 }
 0x23d   : > { %328 = sbr.rel (%p517_p11) target bundleno = 592 (0x250), region = 48 }
 0x242   : > { %v331_v36 = vld [vmem:[#allocation3] sm:$0xff]  ;;  %v332_v37 = vld [vmem:[#allocation3 + $0x8] sm:$0xff]  ;;  %v329_v39 = vld [vmem:[#allocation2] sm:$0xff]  ;;  %vm339_vm3 = vcmask 7168  }
 0x243   : > { %644 = vlog2.f32 %v331_v36  ;;  %v330_v42 = vld [vmem:[#allocation2 + $0x8] sm:$0xff] }
 0x244   : > { %646 = vlog2.f32 %v332_v37 }
 0x249   : > { %v645_v38 = vpop.eup %644 }
 0x24a   : > { %v647_v40 = vpop.eup %646  ;;  %v334_v41 = vmul.f32 0.6931472, %v645_v38 }
 0x24b   : > { %v336_v43 = vmul.f32 0.6931472, %v647_v40 }
 0x24c   : > { %v337_v44 = vadd.f32 %v334_v41, %v329_v39 }
 0x24d   : > { %v338_v45 = vadd.f32 %v336_v43, %v330_v42 }
 0x24e   : > { %340 = vst.msk [vmem:[#allocation2] sm:$0xff] %vm339_vm3, %v337_v44 }
 0x24f   : > { %341 = vst.msk [vmem:[#allocation2 + $0x8] sm:$0xff] %vm339_vm3, %v338_v45 }
 0x250 PF: > { %p518_p0 = scmp.lt.s32.totalorder %s805_s13, 1 }
 0x251   : > { %s519_s3 = sadd.s32 (!%p518_p0), 4294967295, %s805_s13 }
 0x252   : > { %345 = sbr.rel (%p518_p0) target bundleno = 727 (0x2d7), region = 52  ;;  %s520_s4 = sshll.u32 (!%p518_p0), %s519_s3, 4 }
 0x253   : > { %s348_s5 = scalar_lea.vmem (!%p518_p0), [#allocation4], %s520_s4 }
 0x257   : > { %v351_v46 = vld [vmem:[#allocation2] sm:$0xff]  ;;  %v822_v47 = vmov 0   ;;  %v352_v48 = vld [vmem:[#allocation2 + $0x8] sm:$0xff] }
 0x258   : > { %648 = vset.pattern.permute.xlu0 %v822_v47  ;;  %v349_v49 = vld [vmem:[%s348_s5] sm:$0xff]  ;;  %v350_v52 = vld [vmem:[%s348_s5 + $0x8] sm:$0xff] }
 0x259   : > { %355 = vperm.xlu0 %648, %v351_v46  }
 0x261   : > { %360 = vperm.xlu0 %648, %v352_v48  }
 0x2cb   : > { %v356_v50 = vpop.permute.xlu0 %355 }
 0x2cc   : > { %v363_v51 = vsub.f32 %v349_v49, %v356_v50 }
 0x2ce   : > { %365 = vst [vmem:[%s943_s29] sm:$0xff] %v363_v51 }
 0x2d3   : > { %v361_v53 = vpop.permute.xlu0 %360 }
 0x2d4   : > { %v364_v54 = vsub.f32 %v350_v52, %v361_v53 }
 0x2d6   : > { %366 = vst [vmem:[%s943_s29 + $0x8] sm:$0xff] %v364_v54 }
 0x2d7 PF: > { %s522_s6 = sadd.s32 4294967295, %s805_s13  ;;  %s384_s7 = sshll.u32 %s943_s29, 4  ;;  %s385_s7 = int_to_ptr.vmem [resolvable:$true] %s384_s7 }
 0x2d8   : > { %p376_p6 = scmp.gt.s32.totalorder %s522_s6, 0  ;;  %s368_s23 = scalar_lea.sflag [#allocation7], %s211_s25 }
 0x2d9   : > { %s729_s28 = scalar_lea.hbm %s1000_s2, 16 }
 0x2da   : > { %s1014_s6 = smov (!%p376_p6, %s522_s6), 0 }
 0x2db   : > { %s523_s8 = sshll.u32 %s1014_s6, 3 }
 0x2dc   : > { %s383_s17 = scalar_lea.hbm %s1000_s2, %s523_s8 }
 0x2dd   : > { %s386_s22 = sshll.u32 %s383_s17, 4  ;;  %s387_s22 = int_to_ptr.hbm [resolvable:$true] %s386_s22 }
 0x2de   : > { %s723_s24 = sshra.s32 %s387_s22, 4  ;;  %s724_s24 = int_to_ptr.hbm [resolvable:$true] %s723_s24 }
 0x2df   : > { %s725_s26 = scalar_lea.hbm %s724_s24, 16  ;;  %p730_p13 = scmp.lt.s32.totalorder %s724_s24, %s1000_s2 }
 0x2e0   : > { %p726_p8 = scmp.ne.s32.totalorder %s724_s24, %s725_s26  ;;  %p731_p2 = scmp.lt.s32.totalorder %s729_s28, %s725_s26 }
 0x2e2   : > { %p727_p10 = pnand %p726_p8, %p889_p7  ;;  %p732_p4 = por %p731_p2, %p730_p13 }
 0x2e4   : > { %p728_p12 = pneg %p727_p10 }
 0x2e6   : > { %p733_p5 = pnand %p732_p4, %p728_p12 }
 0x2e8   : > { %736 = shalt.err (!%p733_p5)
}
 0x2e9   : > { %s823_s25 = smov 128   ;;  %s824_s19 = smov 8  }
 0x2ea   : > { %535 = dma.vmem_to_hbm [thread:$0]  (%p889_p7), %s385_s7, 256, %s387_s22, %s368_s23, %s823_s25, %s823_s25, %s824_s19  }
 0x2eb PF: > { %s401_s3 = sand.u32 1, %s789_s9   ;;  %p1006_p1 = scmp.ge.s32.totalorder %s813_s15, 2 }
 0x2ec   : > { %s402_s4 = scalar_lea.sflag [#allocation7], %s401_s3 }
 0x2ed   : > { %p546_p3 = pnand %p1006_p1, %p894_p9 }
 0x2ef   : > { %p547_p11 = pneg %p546_p3 }
 0x2f1   : > { %782 = dma.done.wait (%p547_p11), %s402_s4, 256  }
 0x2f2   : > { %784 = vsyncadd (%p547_p11), %s402_s4, 4294967040  ;;  %s19_s15 = sadd.s32 1, %s813_s15   ;;  %s1007_s9 = smov %s793_s10 }
 0x2f3   : > { %p16_p0 = scmp.ge.s32.totalorder %s19_s15, 4   ;;  %s983_s10 = smov 0  }
 0x2f4   : > { %s1008_s11 = smov %s801_s12  ;;  %s988_s12 = smov 0  }
 0x2f5   : > { %s1009_s13 = smov %s809_s14  ;;  %s1010_s14 = smov %s1012_s30 }
 0x2f6   :  { %18 = sbr.rel (!%p16_p0) target bundleno = 8 (0x8), region = 97 }
 0x2fb   :  { %408 = vsyncpa [#allocation6], 1 }
 0x2fc   :  { %410 = vsyncpa [#allocation6 + $0x1], 1 }
 0x2fd   :  { %411 = vsyncpa [#allocation9], 1 }
 0x2fe   :  { %413 = vsyncpa [#allocation9 + $0x1], 1 }
 0x2ff   :  { %414 = vsyncpa [#allocation7], 1 }
 0x300   :  { %416 = vsyncpa [#allocation7 + $0x1], 1 }

</bundles_post_ra>
